<compile_context>
chip_gen: v7x
topology: tpu7x:2x2x1
jax: 0.10.0
libtpu: 0.0.40
codegen_flags: <defaults>
</compile_context>

<pallas_src>
import functools

import jax
import jax.numpy as jnp
from jax.experimental import pallas as pl
from jax.experimental.pallas import tpu as pltpu


def _round_up(a: int, b: int) -> int:
    return (a + b - 1) // b * b


def _swiglu_kernel(x_ref, w1t_ref, w3t_ref, w2t_ref, o_ref, acc_ref):
    # Grid: (token tiles, d_ff tiles).  d_ff axis is the reduction axis.
    j = pl.program_id(1)

    @pl.when(j == 0)
    def _():
        acc_ref[...] = jnp.zeros_like(acc_ref)

    x = x_ref[...]                              # [TM, d_model]
    # x1 = x @ w1^T, x3 = x @ w3^T  (weights pre-transposed -> plain dots)
    x1 = jnp.dot(x, w1t_ref[...], preferred_element_type=jnp.float32)  # [TM, TF]
    x3 = jnp.dot(x, w3t_ref[...], preferred_element_type=jnp.float32)  # [TM, TF]

    # SiLU(x1) * x3 in f32 (keeps elementwise math in f32 regardless of input dtype)
    h = (x1 * jax.nn.sigmoid(x1)) * x3                                  # [TM, TF]

    # Partial contribution of this d_ff tile to the output: h @ w2^T
    acc_ref[...] += jnp.dot(h.astype(x.dtype), w2t_ref[...],
                            preferred_element_type=jnp.float32)         # [TM, d_model]

    @pl.when(j == pl.num_programs(1) - 1)
    def _():
        o_ref[...] = acc_ref[...].astype(o_ref.dtype)


@functools.partial(jax.jit, static_argnames=("block_m", "block_f"))
def swiglu_pallas(x, w1, w2, w3, *, block_m=256, block_f=512):
    """SwiGLU forward: (silu(x @ w1^T) * (x @ w3^T)) @ w2^T over the last axis.

    w1, w3: [d_ff, d_model]; w2: [d_model, d_ff] (PyTorch layout).
    NOTE: for v7x (64 MiB VMEM/TC) prefer smaller block_f (e.g. 256-512 bf16).
    """
    orig_shape = x.shape
    d_model = orig_shape[-1]
    d_ff = w1.shape[0]

    x2d = x.reshape(-1, d_model)
    m = x2d.shape[0]

    # One-time wrapper-side transposes so K lands on the sublane axis in-kernel.
    w1t = w1.T                                  # [d_model, d_ff]
    w3t = w3.T                                  # [d_model, d_ff]
    w2t = w2.T                                  # [d_ff, d_model]

    # Tile sizes (clamped to problem size) + padding for non-divisible extents.
    tm = min(block_m, _round_up(m, 8))
    m_pad = _round_up(m, tm)
    tf = min(block_f, _round_up(d_ff, 128))
    f_pad = _round_up(d_ff, tf)

    if m_pad != m:
        x2d = jnp.pad(x2d, ((0, m_pad - m), (0, 0)))
    if f_pad != d_ff:
        # Zero-padded d_ff columns/rows contribute exactly zero to the output.
        w1t = jnp.pad(w1t, ((0, 0), (0, f_pad - d_ff)))
        w3t = jnp.pad(w3t, ((0, 0), (0, f_pad - d_ff)))
        w2t = jnp.pad(w2t, ((0, f_pad - d_ff), (0, 0)))

    grid = (m_pad // tm, f_pad // tf)

    # VMEM budget estimate (double-buffered inputs/outputs + f32 accumulator).
    itemsize = jnp.dtype(x.dtype).itemsize
    vmem_est = (
        2 * tm * d_model * itemsize            # x tile
        + 2 * 2 * d_model * tf * itemsize      # w1t, w3t tiles
        + 2 * tf * d_model * itemsize          # w2t tile
        + 2 * tm * d_model * itemsize          # out tile
        + tm * d_model * 4                     # f32 accumulator scratch
    )
    vmem_limit = int(min(max(int(1.25 * vmem_est), 32 * 1024 * 1024),
                         128 * 1024 * 1024))

    out2d = pl.pallas_call(
        _swiglu_kernel,
        out_shape=jax.ShapeDtypeStruct((m_pad, d_model), x.dtype),
        grid_spec=pltpu.PrefetchScalarGridSpec(
            num_scalar_prefetch=0,
            grid=grid,
            in_specs=[
                pl.BlockSpec((tm, d_model), lambda i, j: (i, 0)),   # x
                pl.BlockSpec((d_model, tf), lambda i, j: (0, j)),   # w1t
                pl.BlockSpec((d_model, tf), lambda i, j: (0, j)),   # w3t
                pl.BlockSpec((tf, d_model), lambda i, j: (j, 0)),   # w2t
            ],
            out_specs=pl.BlockSpec((tm, d_model), lambda i, j: (i, 0)),
            scratch_shapes=[pltpu.VMEM((tm, d_model), jnp.float32)],
        ),
        compiler_params=pltpu.CompilerParams(
            dimension_semantics=("parallel", "arbitrary"),
            vmem_limit_bytes=vmem_limit,
        ),
    )(x2d, w1t, w3t, w2t)

    return out2d[:m].reshape(orig_shape)


def swiglu_reference(x, w1, w2, w3):
    x1 = jnp.einsum("...d,fd->...f", x, w1)
    x3 = jnp.einsum("...d,fd->...f", x, w3)
    h = x1 * jax.nn.sigmoid(x1) * x3
    return jnp.einsum("...f,df->...d", h, w2)


if __name__ == "__main__":
    batch, seq, d_model, d_ff = 2, 8, 32, 64

    key = jax.random.PRNGKey(0)
    kx, k1, k2, k3 = jax.random.split(key, 4)
    x = jax.random.normal(kx, (batch, seq, d_model), dtype=jnp.float32)
    w1 = jax.random.normal(k1, (d_ff, d_model), dtype=jnp.float32) * 0.05
    w2 = jax.random.normal(k2, (d_model, d_ff), dtype=jnp.float32) * 0.05
    w3 = jax.random.normal(k3, (d_ff, d_model), dtype=jnp.float32) * 0.05

    out = swiglu_pallas(x, w1, w2, w3)
    out = jax.block_until_ready(out)

    ref = swiglu_reference(x, w1, w2, w3)
    assert out.shape == (batch, seq, d_model)
    assert jnp.allclose(out, ref, atol=1e-4, rtol=1e-4), "mismatch vs reference"

    print("KERNEL_OK")
</pallas_src>

<mosaic_0001>
module attributes {stable_mosaic.version = 11 : i64} {
  func.func @_swiglu_kernel(%arg0: i32, %arg1: i32, %arg2: memref<16x32xf32, #tpu.memory_space<vmem>>, %arg3: memref<32x128xf32, #tpu.memory_space<vmem>>, %arg4: memref<32x128xf32, #tpu.memory_space<vmem>>, %arg5: memref<128x32xf32, #tpu.memory_space<vmem>>, %arg6: memref<16x32xf32, #tpu.memory_space<vmem>>, %arg7: memref<16x32xf32, #tpu.memory_space<vmem>>) attributes {dimension_semantics = [#tpu.dimension_semantics<parallel>, #tpu.dimension_semantics<arbitrary>], iteration_bounds = array<i64: 1, 1>, scalar_prefetch = 0 : i64, scratch_operands = 1 : i64, tpu.core_type = #tpu.core_type<tc>, window_params = [{transform_indices = @transform_0, window_bounds = array<i64: 16, 32>}, {transform_indices = @transform_1, window_bounds = array<i64: 32, 128>}, {transform_indices = @transform_2, window_bounds = array<i64: 32, 128>}, {transform_indices = @transform_3, window_bounds = array<i64: 128, 32>}, {transform_indices = @transform_4, window_bounds = array<i64: 16, 32>}]} {
    %c0_i32 = arith.constant 0 : i32
    %0 = arith.cmpi eq, %arg1, %c0_i32 : i32
    %1 = arith.extui %0 : i1 to i32
    %c0_i32_0 = arith.constant 0 : i32
    %2 = arith.cmpi ne, %1, %c0_i32_0 : i32
    scf.if %2 {
      %cst_17 = arith.constant 0.000000e+00 : f32
      %23 = vector.broadcast %cst_17 : f32 to vector<16x32xf32>
      %c0_18 = arith.constant 0 : index
      %c0_19 = arith.constant 0 : index
      %24 = vector.load %arg7[%c0_18, %c0_19] : memref<16x32xf32, #tpu.memory_space<vmem>>, vector<16x32xf32>
      tpu.vector_store %arg7[%c0_18, %c0_19], %23 {strides = array<i32>} : memref<16x32xf32, #tpu.memory_space<vmem>>, vector<16x32xf32>,
    } else {
    }
    %c0 = arith.constant 0 : index
    %c0_1 = arith.constant 0 : index
    %3 = vector.load %arg2[%c0, %c0_1] : memref<16x32xf32, #tpu.memory_space<vmem>>, vector<16x32xf32>
    %c0_2 = arith.constant 0 : index
    %c0_3 = arith.constant 0 : index
    %4 = vector.load %arg3[%c0_2, %c0_3] : memref<32x128xf32, #tpu.memory_space<vmem>>, vector<32x128xf32>
    %cst = arith.constant dense<0.000000e+00> : vector<16x128xf32>
    %5 = tpu.matmul %3, %4, %cst {dimension_numbers = #tpu.dot_dimension_numbers<[1], [0], [0], [1], [0, 0, 1, 1], [], []>} : vector<16x32xf32>, vector<32x128xf32>, vector<16x128xf32> -> vector<16x128xf32>
    %c0_4 = arith.constant 0 : index
    %c0_5 = arith.constant 0 : index
    %6 = vector.load %arg4[%c0_4, %c0_5] : memref<32x128xf32, #tpu.memory_space<vmem>>, vector<32x128xf32>
    %cst_6 = arith.constant dense<0.000000e+00> : vector<16x128xf32>
    %7 = tpu.matmul %3, %6, %cst_6 {dimension_numbers = #tpu.dot_dimension_numbers<[1], [0], [0], [1], [0, 0, 1, 1], [], []>} : vector<16x32xf32>, vector<32x128xf32>, vector<16x128xf32> -> vector<16x128xf32>
    %8 = arith.negf %5 : vector<16x128xf32>
    %9 = math.exp %8 : vector<16x128xf32>
    %cst_7 = arith.constant 1.000000e+00 : f32
    %10 = vector.broadcast %cst_7 : f32 to vector<16x128xf32>
    %11 = arith.addf %10, %9 : vector<16x128xf32>
    %12 = arith.divf %10, %11 : vector<16x128xf32>
    %13 = arith.mulf %5, %12 : vector<16x128xf32>
    %14 = arith.mulf %13, %7 : vector<16x128xf32>
    %c0_8 = arith.constant 0 : index
    %c0_9 = arith.constant 0 : index
    %15 = vector.load %arg7[%c0_8, %c0_9] : memref<16x32xf32, #tpu.memory_space<vmem>>, vector<16x32xf32>
    %c0_10 = arith.constant 0 : index
    %c0_11 = arith.constant 0 : index
    %16 = vector.load %arg5[%c0_10, %c0_11] : memref<128x32xf32, #tpu.memory_space<vmem>>, vector<128x32xf32>
    %cst_12 = arith.constant dense<0.000000e+00> : vector<16x32xf32>
    %17 = tpu.matmul %14, %16, %cst_12 {dimension_numbers = #tpu.dot_dimension_numbers<[1], [0], [0], [1], [0, 0, 1, 1], [], []>} : vector<16x128xf32>, vector<128x32xf32>, vector<16x32xf32> -> vector<16x32xf32>
    %18 = arith.addf %15, %17 : vector<16x32xf32>
    %c0_13 = arith.constant 0 : index
    %c0_14 = arith.constant 0 : index
    %19 = vector.load %arg7[%c0_13, %c0_14] : memref<16x32xf32, #tpu.memory_space<vmem>>, vector<16x32xf32>
    tpu.vector_store %arg7[%c0_13, %c0_14], %18 {strides = array<i32>} : memref<16x32xf32, #tpu.memory_space<vmem>>, vector<16x32xf32>,
    %c0_i32_15 = arith.constant 0 : i32
    %20 = arith.cmpi eq, %arg1, %c0_i32_15 : i32
    %21 = arith.extui %20 : i1 to i32
    %c0_i32_16 = arith.constant 0 : i32
    %22 = arith.cmpi ne, %21, %c0_i32_16 : i32
    scf.if %22 {
      %c0_17 = arith.constant 0 : index
      %c0_18 = arith.constant 0 : index
      %23 = vector.load %arg7[%c0_17, %c0_18] : memref<16x32xf32, #tpu.memory_space<vmem>>, vector<16x32xf32>
      %c0_19 = arith.constant 0 : index
      %c0_20 = arith.constant 0 : index
      %24 = vector.load %arg6[%c0_19, %c0_20] : memref<16x32xf32, #tpu.memory_space<vmem>>, vector<16x32xf32>
      tpu.vector_store %arg6[%c0_19, %c0_20], %23 {strides = array<i32>} : memref<16x32xf32, #tpu.memory_space<vmem>>, vector<16x32xf32>,
    } else {
    }
    return
  }
  func.func @transform_0(%arg0: i32, %arg1: i32) -> (i32, i32) {
    %c0_i32 = arith.constant 0 : i32
    %c0_i32_0 = arith.constant 0 : i32
    return %arg0, %c0_i32 : i32, i32
  }
  func.func @transform_1(%arg0: i32, %arg1: i32) -> (i32, i32) {
    %c0_i32 = arith.constant 0 : i32
    %c0_i32_0 = arith.constant 0 : i32
    return %c0_i32, %arg1 : i32, i32
  }
  func.func @transform_2(%arg0: i32, %arg1: i32) -> (i32, i32) {
    %c0_i32 = arith.constant 0 : i32
    %c0_i32_0 = arith.constant 0 : i32
    return %c0_i32, %arg1 : i32, i32
  }
  func.func @transform_3(%arg0: i32, %arg1: i32) -> (i32, i32) {
    %c0_i32 = arith.constant 0 : i32
    %c0_i32_0 = arith.constant 0 : i32
    return %arg1, %c0_i32 : i32, i32
  }
  func.func @transform_4(%arg0: i32, %arg1: i32) -> (i32, i32) {
    %c0_i32 = arith.constant 0 : i32
    %c0_i32_0 = arith.constant 0 : i32
    return %arg0, %c0_i32 : i32, i32
  }
}

</mosaic_0001>

<bundles_post_ra>
// kernel: swiglu_pallas.1
= control target key start
LH: loop header
LB: loop body
LE: loop exit
PB: predicated region body
PF: predicated region fallthrough
CT: control target
= control target key end

     0   :  { %vm22_vm0 = vcmask 261120   ;;  %s634_s0 = inlined_call_operand.vmem [shape: f32[16,32], index: 0, kind: input, shape index: {}]   ;;  %s635_s1 = inlined_call_operand.vmem [shape: f32[32,128], index: 1, kind: input, shape index: {}]   ;;  %s636_s2 = inlined_call_operand.vmem [shape: f32[32,128], index: 2, kind: input, shape index: {}]   ;;  %s637_s3 = inlined_call_operand.vmem [shape: f32[128,32], index: 3, kind: input, shape index: {}]   ;;  %s638_s4 = inlined_call_operand.hbm [shape: f32[16,32], index: 4, kind: output, shape index: {}]  }
   0x1   :  { %v27_v0 = vld [vmem:[%s635_s1] sm:$0xff]  ;;  %v28_v1 = vld [vmem:[%s635_s1 + $0x8] sm:$0xff]  ;;  %v29_v2 = vld [vmem:[%s635_s1 + $0x10] sm:$0xff] }
   0x2   :  { %v421_v3 = vpack.c.bf16 %v28_v1, %v27_v0  ;;  %v30_v4 = vld [vmem:[%s635_s1 + $0x18] sm:$0xff]  ;;  %v25_v5 = vld [vmem:[%s634_s0] sm:$0xff]  ;;  %v114_v8 = vld [vmem:[%s636_s2 + $0x8] sm:$0xff] }
   0x3   :  { %v425_v6 = vpack.c.bf16 %v30_v4, %v29_v2  ;;  %372 = vmatprep.mubr.msk.f32.mxu1 %vm22_vm0, %v25_v5  ;;  %v113_v7 = vld [vmem:[%s636_s2] sm:$0xff] }
   0x4   :  { %422 = vmatprep.subr.bf16.mxu1 %v421_v3 }
   0x5   :  { %9 = vsyncpa [#allocation4], 0  ;;  %424 = vmatpush3.bf16.msra.mxu1 %v421_v3  ;;  %v429_v9 = vpack.c.bf16 %v114_v8, %v113_v7  ;;  %v115_v10 = vld [vmem:[%s636_s2 + $0x10] sm:$0xff]  ;;  %v116_v11 = vld [vmem:[%s636_s2 + $0x18] sm:$0xff]  ;;  %v505_v38 = vmov 0.0  }
   0x6   :  { %426 = vmatprep.subr.bf16.mxu1 %v425_v6  ;;  %v26_v12 = vld [vmem:[%s634_s0 + $0x8] sm:$0xff]  ;;  %v433_v13 = vpack.c.bf16 %v116_v11, %v115_v10  ;;  %v210_v14 = vld [vmem:[%s637_s3] sm:$0xff]  ;;  %v212_v17 = vld [vmem:[%s637_s3 + $0x10] sm:$0xff]  ;;  %24 = vst.msk [vmem:[#allocation2 + $0x8] sm:$0xff] %vm22_vm0, %v505_v38 }
   0x7   :  { %v211_v15 = vld [vmem:[%s637_s3 + $0x8] sm:$0xff]  ;;  %v213_v18 = vld [vmem:[%s637_s3 + $0x18] sm:$0xff]  ;;  %v214_v20 = vld [vmem:[%s637_s3 + $0x20] sm:$0xff]  ;;  %23 = vst.msk [vmem:[#allocation2] sm:$0xff] %vm22_vm0, %v505_v38 }
   0x8   :  { %v437_v16 = vpack.c.bf16 %v211_v15, %v210_v14  ;;  %v441_v19 = vpack.c.bf16 %v213_v18, %v212_v17  ;;  %v215_v21 = vld [vmem:[%s637_s3 + $0x28] sm:$0xff]  ;;  %v216_v23 = vld [vmem:[%s637_s3 + $0x30] sm:$0xff]  ;;  %v217_v24 = vld [vmem:[%s637_s3 + $0x38] sm:$0xff] }
   0x9   :  { %428 = vmatpush3.bf16.msra.mxu1 %v425_v6  ;;  %v445_v22 = vpack.c.bf16 %v215_v21, %v214_v20  ;;  %v449_v25 = vpack.c.bf16 %v217_v24, %v216_v23  ;;  %v218_v26 = vld [vmem:[%s637_s3 + $0x40] sm:$0xff]  ;;  %v219_v27 = vld [vmem:[%s637_s3 + $0x48] sm:$0xff]  ;;  %v220_v29 = vld [vmem:[%s637_s3 + $0x50] sm:$0xff] }
   0xa   :  { %430 = vmatprep.subr.bf16.mxu1 %v429_v9  ;;  %438 = vmatprep.subr.bf16.mxu0 %v437_v16  ;;  %v453_v28 = vpack.c.bf16 %v219_v27, %v218_v26  ;;  %v221_v30 = vld [vmem:[%s637_s3 + $0x58] sm:$0xff]  ;;  %v222_v32 = vld [vmem:[%s637_s3 + $0x60] sm:$0xff]  ;;  %v223_v33 = vld [vmem:[%s637_s3 + $0x68] sm:$0xff] }
   0xb   :  { %440 = vmatpush3.bf16.msra.mxu0 %v437_v16  ;;  %v457_v31 = vpack.c.bf16 %v221_v30, %v220_v29  ;;  %v461_v34 = vpack.c.bf16 %v223_v33, %v222_v32  ;;  %v224_v35 = vld [vmem:[%s637_s3 + $0x70] sm:$0xff]  ;;  %v225_v36 = vld [vmem:[%s637_s3 + $0x78] sm:$0xff]  ;;  %s506_s3 = smov [#allocation3]  }
   0xc   :  { %373 = vmatmul.mubr.msk.f32.vlgmr.msra.gmra.mrb[0].mxu1 %vm22_vm0, %v26_v12  ;;  %442 = vmatprep.subr.bf16.mxu0 %v441_v19  ;;  %v465_v37 = vpack.c.bf16 %v225_v36, %v224_v35  ;;  %s317_s10 = sshll.u32 %s506_s3, 4  ;;  %s318_s10 = int_to_ptr.vmem [resolvable:$true] %s317_s10 }
   0xd   :  { %432 = vmatpush3.bf16.msra.mxu1 %v429_v9  ;;  %383 = vmatprep.mubr.msk.f32.mxu1 %vm22_vm0, %v25_v5  ;;  %v209_v55 = vld [vmem:[#allocation2 + $0x8] sm:$0xff]  ;;  %s481_s0 = scalar_lea.vmem %s318_s10, 256  ;;  %p486_p1 = scmp.lt.s32.totalorder %s318_s10, %s318_s10 }
   0xe   :  { %434 = vmatprep.subr.bf16.mxu1 %v433_v13  ;;  %v208_v56 = vld [vmem:[#allocation2] sm:$0xff]  ;;  %p482_p0 = scmp.ne.s32.totalorder %s318_s10, %s481_s0  ;;  %p487_p2 = scmp.lt.s32.totalorder %s481_s0, %s481_s0 }
   0xf   :  { %444 = vmatpush3.bf16.msra.mxu0 %v441_v19 }
  0x10   :  { %446 = vmatprep.subr.bf16.mxu0 %v445_v22  ;;  %p488_p3 = por %p487_p2, %p486_p1 }
  0x11   :  { %436 = vmatpush3.bf16.msra.mxu1 %v433_v13 }
  0x12   :  { %p489_p4 = pnand %p488_p3, %p482_p0 }
  0x13   :  { %448 = vmatpush3.bf16.msra.mxu0 %v445_v22 }
  0x14   :  { %384 = vmatmul.mubr.msk.f32.vlgmr.msra.gmra.mrb[2].mxu1 %vm22_vm0, %v26_v12  ;;  %450 = vmatprep.subr.bf16.mxu0 %v449_v25 }
  0x17   :  { %452 = vmatpush3.bf16.msra.mxu0 %v449_v25 }
  0x18   :  { %454 = vmatprep.subr.bf16.mxu0 %v453_v28 }
  0x1b   :  { %456 = vmatpush3.bf16.msra.mxu0 %v453_v28 }
  0x1c   :  { %458 = vmatprep.subr.bf16.mxu0 %v457_v31 }
  0x1f   :  { %460 = vmatpush3.bf16.msra.mxu0 %v457_v31 }
  0x20   :  { %462 = vmatprep.subr.bf16.mxu0 %v461_v34 }
  0x23   :  { %464 = vmatpush3.bf16.msra.mxu0 %v461_v34 }
  0x24   :  { %466 = vmatprep.subr.bf16.mxu0 %v465_v37 }
  0x27   :  { %468 = vmatpush3.bf16.msra.mxu0 %v465_v37 }
  0xdf   :  { %v374_v39 = vpop.f32.mrb[0].mxu1 }
  0xe0   :  { %v333_v40 = vmul.f32 -1.442695, %v374_v39  ;;  %v104_v41 = vpop.f32.mrb[1].mxu1 }
  0xe1   :  { %v332_v42 = vmul.f32 -1.442695, %v104_v41 }
  0xe2   :  { %473 = vpow2.f32 %v333_v40 }
  0xe3   :  { %475 = vpow2.f32 %v332_v42 }
  0xe7   :  { %v385_v43 = vpop.f32.mrb[2].mxu1 }
  0xe8   :  { %v183_v44 = vpop.f32.mrb[3].mxu1 }
  0xec   :  { %v474_v45 = vpop.eup %473 }
  0xed   :  { %v476_v46 = vpop.eup %475  ;;  %v199_v47 = vadd.f32 1.0, %v474_v45 }
  0xee   :  { %v198_v48 = vadd.f32 1.0, %v476_v46 }
  0xef   :  { %477 = vrcp.f32 %v199_v47 }
  0xf0   :  { %479 = vrcp.f32 %v198_v48 }
  0xf9   :  { %v478_v49 = vpop.eup %477 }
  0xfa   :  { %v480_v50 = vpop.eup %479  ;;  %v205_v51 = vmul.f32 %v478_v49, %v374_v39 }
  0xfb   :  { %v204_v52 = vmul.f32 %v480_v50, %v104_v41 }
  0xfc   :  { %v207_v53 = vmul.f32 %v385_v43, %v205_v51 }
  0xfd   :  { %v206_v54 = vmul.f32 %v204_v52, %v183_v44 }
  0xff   :  { %418 = vmatprep.mubr.f32.mxu0 %v206_v54 }
 0x100   :  { %419 = vmatmul.mubr.f32.vlgmr.msra.gmra.mrb[0].mxu0 %v207_v53 }
 0x1d3   :  { %v420_v57 = vpop.f32.mrb[0].mxu0 }
 0x1d4   :  { %v302_v58 = vadd.f32 %v420_v57, %v209_v55  ;;  %v292_v59 = vpop.f32.mrb[1].mxu0 }
 0x1d5   :  { %v301_v60 = vadd.f32 %v292_v59, %v208_v56 }
 0x1d6   :  { %304 = vst.msk [vmem:[#allocation2 + $0x8] sm:$0xff] %vm22_vm0, %v302_v58 }
 0x1d7   :  { %303 = vst.msk [vmem:[#allocation2] sm:$0xff] %vm22_vm0, %v301_v60 }
 0x1dd   :  { %v309_v61 = vld [vmem:[#allocation2 + $0x8] sm:$0xff] }
 0x1de   :  { %v308_v62 = vld [vmem:[#allocation2] sm:$0xff]  ;;  %311 = vst.msk [vmem:[#allocation3 + $0x8] sm:$0xff] %vm22_vm0, %v309_v61 }
 0x1df   :  { %310 = vst.msk [vmem:[#allocation3] sm:$0xff] %vm22_vm0, %v308_v62 }
 0x1e0   :  { %492 = shalt.err (!%p489_p4)
}
 0x1e1   :  { %s493_s13 = scalar_lea.hbm %s638_s4, 256 }
 0x1e2   :  { %p494_p5 = scmp.ne.s32.totalorder %s638_s4, %s493_s13  ;;  %p497_p6 = scmp.lt.u32.totalorder %s493_s13, %s638_s4 }
 0x1e4   :  { %p499_p7 = pnand %p497_p6, %p494_p5 }
 0x1e6   :  { %502 = shalt.err (!%p499_p7)
}
 0x1e7   :  { %s507_s18 = smov 128   ;;  %s508_s19 = smov 8  }
 0x1e8   :  { %323 = dma.vmem_to_hbm [thread:$0]  %s318_s10, 256, %s638_s4, [#allocation4], %s507_s18, %s507_s18, %s508_s19  }
 0x1e9   :  { %503 = dma.done.wait [#allocation4], 256  }
 0x1ea   :  { %504 = vsyncadd [#allocation4], 4294967040 }
 0x1eb   :  { %327 = vsyncpa [#allocation4], 1 }

</bundles_post_ra>
